<compile_context>
chip_gen: v6e
topology: v6e:2x2x1
jax: 0.10.0
libtpu: 0.0.40
codegen_flags: <defaults>
</compile_context>

<pallas_src>
import jax
import jax.numpy as jnp
from jax.experimental import pallas as pl
from jax.experimental.pallas import tpu as pltpu


def _model_kernel(x_ref, o_ref):
    # x_ref: (1, 24) f32 in VMEM (whole array, untiled).
    # o_ref: (1,)    f32 in SMEM (scalar result).
    x = x_ref[...]
    v0 = x * x                                        # pow(input, 2)
    v1 = jnp.sum(v0, axis=-1, keepdims=True)          # (1, 1) single lane reduce
    v2 = v1 + 3.0
    v3 = jnp.maximum(v2, 0.0)                         # clamp(min=0)
    v4 = v3                                           # Identity module
    for _ in range(2):                                # ModuleList of 2 Sigmoids
        v5 = v4 * v3
        v4 = jax.nn.sigmoid(v5)
    res = v4 - 0.5                                    # (1, 1)
    o_ref[0] = res[0, 0]                              # scalar store to SMEM


def model_forward(x):
    """x: float32 array of shape (4, 2, 3). Returns a 0-dim float32 scalar."""
    flat = jnp.reshape(x, (1, -1)).astype(jnp.float32)      # (1, 24), no padding
    n = flat.shape[1]

    out = pl.pallas_call(
        _model_kernel,
        out_shape=jax.ShapeDtypeStruct((1,), jnp.float32),
        in_specs=[pl.BlockSpec(memory_space=pltpu.MemorySpace.VMEM)],
        out_specs=pl.BlockSpec(memory_space=pltpu.MemorySpace.SMEM),
        cost_estimate=pl.CostEstimate(
            flops=8 * n,            # square + reduce + a few (1,1) elementwise ops
            transcendentals=2,      # two sigmoids
            bytes_accessed=4 * (n + 1),
        ),
    )(flat)
    return out[0]  # 0-dim scalar, like torch


def _reference(x):
    v0 = x * x
    v1 = jnp.sum(v0)
    v3 = jnp.maximum(v1 + 3.0, 0.0)
    v4 = v3
    for _ in range(2):
        v4 = jax.nn.sigmoid(v4 * v3)
    return v4 - 0.5


if __name__ == "__main__":
    key = jax.random.PRNGKey(0)
    x = jax.random.normal(key, (4, 2, 3), dtype=jnp.float32)

    y = model_forward(x)
    jax.block_until_ready(y)

    y_ref = _reference(x)
    assert y.shape == ()
    assert jnp.allclose(y, y_ref, atol=1e-5, rtol=1e-5), (y, y_ref)

    print("KERNEL_OK")
</pallas_src>

<mosaic_0001>
module attributes {stable_mosaic.version = 11 : i64} {
  func.func @_model_kernel(%arg0: memref<1x24xf32, #tpu.memory_space<vmem>>, %arg1: memref<1xf32, #tpu.memory_space<smem>>) attributes {dimension_semantics = [], scalar_prefetch = 0 : i64, scratch_operands = 0 : i64, tpu.core_type = #tpu.core_type<tc>} {
    %c0 = arith.constant 0 : index
    %c0_0 = arith.constant 0 : index
    %0 = vector.load %arg0[%c0, %c0_0] : memref<1x24xf32, #tpu.memory_space<vmem>>, vector<1x24xf32>
    %1 = arith.mulf %0, %0 : vector<1x24xf32>
    %cst = arith.constant dense<0.000000e+00> : vector<1xf32>
    %2 = vector.multi_reduction <add>, %1, %cst [1] : vector<1x24xf32> to vector<1xf32>
    %3 = vector.shape_cast %2 : vector<1xf32> to vector<1x1xf32>
    %cst_1 = arith.constant 3.000000e+00 : f32
    %4 = vector.broadcast %cst_1 : f32 to vector<1x1xf32>
    %5 = arith.addf %3, %4 : vector<1x1xf32>
    %cst_2 = arith.constant 0.000000e+00 : f32
    %6 = vector.broadcast %cst_2 : f32 to vector<1x1xf32>
    %7 = arith.maximumf %5, %6 : vector<1x1xf32>
    %8 = arith.mulf %7, %7 : vector<1x1xf32>
    %9 = arith.negf %8 : vector<1x1xf32>
    %10 = math.exp %9 : vector<1x1xf32>
    %cst_3 = arith.constant 1.000000e+00 : f32
    %11 = vector.broadcast %cst_3 : f32 to vector<1x1xf32>
    %12 = arith.addf %11, %10 : vector<1x1xf32>
    %13 = arith.divf %11, %12 : vector<1x1xf32>
    %14 = arith.mulf %13, %7 : vector<1x1xf32>
    %15 = arith.negf %14 : vector<1x1xf32>
    %16 = math.exp %15 : vector<1x1xf32>
    %cst_4 = arith.constant 1.000000e+00 : f32
    %17 = vector.broadcast %cst_4 : f32 to vector<1x1xf32>
    %18 = arith.addf %17, %16 : vector<1x1xf32>
    %19 = arith.divf %17, %18 : vector<1x1xf32>
    %cst_5 = arith.constant 5.000000e-01 : f32
    %20 = vector.broadcast %cst_5 : f32 to vector<1x1xf32>
    %21 = arith.subf %19, %20 : vector<1x1xf32>
    %22 = vector.extract %21[0, 0] : f32 from vector<1x1xf32>
    %c0_6 = arith.constant 0 : index
    %23 = memref.load %arg1[%c0_6] : memref<1xf32, #tpu.memory_space<smem>>
    memref.store %22, %arg1[%c0_6] : memref<1xf32, #tpu.memory_space<smem>>
    return
  }
}

</mosaic_0001>

<bundles_post_ra>
// kernel: tpu_custom_call.1
= control target key start
LH: loop header
LB: loop body
LE: loop exit
PB: predicated region body
PF: predicated region fallthrough
CT: control target
= control target key end

     0   :  { %6 = vsyncpa [#allocation3], 0  ;;  %s126_s0 = inlined_call_operand.hbm [shape: f32[1,24], index: 0, kind: input, shape index: {}]   ;;  %s127_s1 = inlined_call_operand.hbm [shape: f32[1], index: 1, kind: output, shape index: {}]  }
   0x1   :  { %7 = vsyncpa [#allocation4], 0  ;;  %s108_s6 = smov [#allocation2]  }
   0x2   :  { %s14_s7 = sshll.u32 %s108_s6, 4  ;;  %s15_s7 = int_to_ptr.vmem [resolvable:$true] %s14_s7 }
   0x3   :  { %s84_s8 = scalar_lea.vmem %s15_s7, 16  ;;  %s88_s9 = scalar_lea.vmem %s15_s7, 32 }
   0x4   :  { %p85_p0 = scmp.ne.s32.totalorder %s15_s7, %s84_s8  ;;  %p89_p1 = scmp.lt.s32.totalorder %s15_s7, %s15_s7 }
   0x5   :  { %p90_p2 = scmp.lt.s32.totalorder %s88_s9, %s84_s8 }
   0x7   :  { %p91_p3 = por %p90_p2, %p89_p1 }
   0x9   :  { %p92_p4 = pnand %p91_p3, %p85_p0 }
   0xb   :  { %95 = shalt.err (!%p92_p4)
}
   0xc   :  { %17 = dma.hbm_to_vmem [thread:$0]  %s126_s0, 16, %s15_s7, [#allocation3]  }
   0xd   :  { %104 = dma.done.wait [#allocation3], 16  }
   0xe   :  { %105 = vsyncadd [#allocation3], 4294967280  ;;  %v21_v0 = vld [vmem:[#allocation2] sm:$0x1]  ;;  %vm23_vm0 = vcmask 188416   ;;  %s109_s12 = smov [#allocation5]  }
   0xf   :  { %v22_v1 = vmul.f32 %v21_v0, %v21_v0 }
  0x11   :  { %v24_v2 = vsel %vm23_vm0, %v22_v1, 0.0 }
  0x12   :  { %25 = vadd.xlane.f32.xlu0 %v24_v2 }
  0x9b   :  { %v26_v3 = vpop.xlane.xlu0 %25 }
  0x9c   :  { %v27_v4 = vadd.f32 3.0, %v26_v3 }
  0x9e   :  { %v28_v5 = vmax.f32 %v27_v4, 0.0 }
  0xa0   :  { %v29_v6 = vmul.f32 %v28_v5, %v28_v5 }
  0xa2   :  { %v61_v7 = vmul.f32 -1.442695, %v29_v6 }
  0xa4   :  { %68 = vpow2.f32 %v61_v7 }
  0xb1   :  { %v69_v8 = vpop.eup %68 }
  0xb2   :  { %v33_v9 = vadd.f32 1.0, %v69_v8 }
  0xb4   :  { %70 = vrcp.f32 %v33_v9 }
  0xc1   :  { %v71_v10 = vpop.eup %70 }
  0xc2   :  { %v36_v11 = vmul.f32 %v71_v10, %v28_v5 }
  0xc4   :  { %v62_v12 = vmul.f32 -1.442695, %v36_v11 }
  0xc6   :  { %72 = vpow2.f32 %v62_v12 }
  0xd3   :  { %v73_v13 = vpop.eup %72 }
  0xd4   :  { %v40_v14 = vadd.f32 1.0, %v73_v13 }
  0xd6   :  { %74 = vrcp.f32 %v40_v14 }
  0xe3   :  { %v75_v15 = vpop.eup %74 }
  0xe4   :  { %v63_v16 = vadd.f32 -0.5, %v75_v15 }
  0xe6   :  { %64 = vpush %v63_v16 }
 0x117   :  { %s65_s0 = spop %64 }
 0x118   :  { %46 = sst [smem:[#allocation5]] %s65_s0 }
 0x119   :  { %54 = dma.smem_to_hbm %s109_s12, 16, %s127_s1, [#allocation4]  }
 0x11a   :  { %106 = dma.done.wait [#allocation4], 16  }
 0x11b   :  { %107 = vsyncadd [#allocation4], 4294967280 }
 0x11c   :  { %58 = sfence }
 0x11d   :  { %59 = vsyncpa [#allocation3], 1 }
 0x11e   :  { %60 = vsyncpa [#allocation4], 1 }

</bundles_post_ra>
